<compile_context>
chip_gen: v5e
topology: v5e:2x2
jax: 0.10.0
libtpu: 0.0.40
codegen_flags: <defaults>
</compile_context>

<pallas_src>
import numpy as np
import jax
import jax.numpy as jnp
from jax.experimental import pallas as pl
from jax.experimental.pallas import tpu as pltpu


# ----------------------------------------------------------------------------
# Kernel
# ----------------------------------------------------------------------------
def _make_pienet_kernel(n_embeds, d_out, has_mask, l2_normalize):
    """Builds a kernel variant (with/without pad mask, with/without l2norm)."""

    def kernel(*refs):
        if has_mask:
            (x_ref, out_in_ref, mask_ref, w1_ref, w2_ref, fcw_ref, fcb_ref,
             ln_g_ref, ln_b_ref, out_o_ref, attn_o_ref, res_o_ref) = refs
        else:
            (x_ref, out_in_ref, w1_ref, w2_ref, fcw_ref, fcb_ref,
             ln_g_ref, ln_b_ref, out_o_ref, attn_o_ref, res_o_ref) = refs
            mask_ref = None

        b_blk, seq_len, d_in = x_ref.shape

        # --- MultiHeadSelfAttention scores: w2(tanh(w1(x))) -----------------
        x3 = x_ref[...]                                     # (b_blk, L, d_in)
        # Flatten batch*seq for one big-M MXU matmul (layout no-op for L % 8 == 0).
        xf = x3.reshape(b_blk * seq_len, d_in)
        h = jnp.tanh(jnp.dot(xf, w1_ref[...],
                             preferred_element_type=jnp.float32))
        logits = jnp.dot(h, w2_ref[...],
                         preferred_element_type=jnp.float32)
        logits = logits.reshape(b_blk, seq_len, n_embeds)   # (b_blk, L, H)

        if has_mask:
            # Additive mask: 0 on valid positions, -1e30 on padding (finite, so a
            # fully-masked row degrades to uniform attention instead of NaN).
            logits = logits + mask_ref[...]                 # (b_blk, L, 1) bcast

        # Softmax over the sequence axis (torch Softmax(dim=1)).
        m = jnp.max(logits, axis=1, keepdims=True)
        e = jnp.exp(logits - m)
        attn = e / jnp.sum(e, axis=1, keepdims=True)        # (b_blk, L, H)
        attn_o_ref[...] = attn.astype(attn_o_ref.dtype)

        out_in = out_in_ref[...]                            # (b_blk, d_out)
        fcw = fcw_ref[...]
        fcb = fcb_ref[...]                                  # (1, d_out)
        gamma = ln_g_ref[...]                               # (1, d_out)
        beta = ln_b_ref[...]                                # (1, d_out)

        # Per-head tail (n_embeds is tiny and static): VPU pooling + 2-D fc/LN,
        # lane-dense d_out-wide stores per head.
        for j in range(n_embeds):
            a_j = attn[:, :, j:j + 1]                       # (b_blk, L, 1)
            # Attention pooling on the VPU: broadcast-multiply + sublane reduce.
            pooled = jnp.sum(a_j * x3, axis=1)              # (b_blk, d_in)

            # --- PIENet residual: dropout(sigmoid(fc(pooled))), p = 0 -------
            res = jax.nn.sigmoid(
                jnp.dot(pooled, fcw, preferred_element_type=jnp.float32) + fcb)

            # --- residual add + LayerNorm(d_out) ----------------------------
            y = out_in + res
            mu = jnp.mean(y, axis=-1, keepdims=True)
            var = jnp.mean((y - mu) ** 2, axis=-1, keepdims=True)
            y = (y - mu) * jax.lax.rsqrt(var + 1e-5)
            y = y * gamma + beta

            # --- EncoderText: l2norm --------------------------------------
            if l2_normalize:
                y = y * jax.lax.rsqrt(jnp.sum(y * y, axis=-1, keepdims=True))

            lo = j * d_out
            hi = lo + d_out
            res_o_ref[:, lo:hi] = res.astype(res_o_ref.dtype)
            out_o_ref[:, lo:hi] = y.astype(out_o_ref.dtype)

    return kernel


# ----------------------------------------------------------------------------
# Wrapper
# ----------------------------------------------------------------------------
def _pick_batch_block(batch, seq_len, d_in, d_out, n_embeds,
                      max_block=128, vmem_budget_bytes=16 * 1024 * 1024):
    """Pick a batch block size: as large as possible, sublane aligned, and with
    2x (double-buffered) per-step blocks comfortably inside a VMEM budget that
    is valid even on v7x (64 MiB physical / 32 MiB scoped default)."""
    per_sample = 4 * (seq_len * d_in            # x block
                      + d_out                   # rnn `out`
                      + seq_len                 # additive pad mask
                      + seq_len * n_embeds      # attn output
                      + 2 * n_embeds * d_out)   # out / residual outputs
    cap = max(8, int(vmem_budget_bytes // (2 * per_sample)))
    blk = min(int(max_block), cap)
    if batch <= blk:
        return batch, batch                     # one grid step, no padding
    blk = max(8, (blk // 8) * 8)                # sublane-aligned blocks
    padded = ((batch + blk - 1) // blk) * blk
    return blk, padded


def pienet_forward(out, x, params, n_embeds, pad_mask=None,
                   l2_normalize=True, block_b=128):
    """out: (B, d_out) GRU state; x: (B, L, d_in) word embeddings;
    pad_mask: optional (B, L) bool, True on padded positions.
    Returns (l2norm(layer_norm(out + residual)), attn, residual)."""
    B, L, d_in = x.shape
    d_h = params["w1"].shape[1]
    d_out = params["fc_w"].shape[1]
    assert params["w2"].shape == (d_h, n_embeds)

    x_f = x.astype(jnp.float32)
    out_f = out.astype(jnp.float32)
    w1 = params["w1"].astype(jnp.float32)
    w2 = params["w2"].astype(jnp.float32)
    fcw = params["fc_w"].astype(jnp.float32)
    fcb = params["fc_b"].reshape(1, d_out).astype(jnp.float32)
    ln_g = params["ln_g"].reshape(1, d_out).astype(jnp.float32)
    ln_b = params["ln_b"].reshape(1, d_out).astype(jnp.float32)

    b_blk, b_padded = _pick_batch_block(B, L, d_in, d_out, n_embeds,
                                        max_block=block_b)
    has_mask = pad_mask is not None

    maskadd = None
    if has_mask:
        maskadd = jnp.where(pad_mask, jnp.float32(-1e30),
                            jnp.float32(0.0)).reshape(B, L, 1)

    if b_padded != B:  # pad the batch so the grid tiles it exactly
        pad = b_padded - B
        x_f = jnp.concatenate(
            [x_f, jnp.zeros((pad, L, d_in), jnp.float32)], axis=0)
        out_f = jnp.concatenate(
            [out_f, jnp.zeros((pad, d_out), jnp.float32)], axis=0)
        if has_mask:
            maskadd = jnp.concatenate(
                [maskadd, jnp.zeros((pad, L, 1), jnp.float32)], axis=0)

    grid = (b_padded // b_blk,)

    in_specs = [
        pl.BlockSpec((b_blk, L, d_in), lambda i: (i, 0, 0)),   # x
        pl.BlockSpec((b_blk, d_out), lambda i: (i, 0)),        # out (no repeat)
    ]
    inputs = [x_f, out_f]
    if has_mask:
        in_specs.append(pl.BlockSpec((b_blk, L, 1), lambda i: (i, 0, 0)))
        inputs.append(maskadd)
    # Weights / LN params: constant index_map -> fetched once, never re-DMA'd.
    in_specs += [
        pl.BlockSpec((d_in, d_h), lambda i: (0, 0)),           # w1
        pl.BlockSpec((d_h, n_embeds), lambda i: (0, 0)),       # w2
        pl.BlockSpec((d_in, d_out), lambda i: (0, 0)),         # fc weight
        pl.BlockSpec((1, d_out), lambda i: (0, 0)),            # fc bias
        pl.BlockSpec((1, d_out), lambda i: (0, 0)),            # ln gamma
        pl.BlockSpec((1, d_out), lambda i: (0, 0)),            # ln beta
    ]
    inputs += [w1, w2, fcw, fcb, ln_g, ln_b]

    out_shapes = (
        jax.ShapeDtypeStruct((b_padded, n_embeds * d_out), jnp.float32),  # out
        jax.ShapeDtypeStruct((b_padded, L, n_embeds), jnp.float32),       # attn
        jax.ShapeDtypeStruct((b_padded, n_embeds * d_out), jnp.float32),  # res
    )
    out_specs = [
        pl.BlockSpec((b_blk, n_embeds * d_out), lambda i: (i, 0)),
        pl.BlockSpec((b_blk, L, n_embeds), lambda i: (i, 0, 0)),
        pl.BlockSpec((b_blk, n_embeds * d_out), lambda i: (i, 0)),
    ]

    kernel = _make_pienet_kernel(n_embeds, d_out, has_mask, l2_normalize)
    out_flat, attn, res_flat = pl.pallas_call(
        kernel,
        out_shape=out_shapes,
        grid=grid,
        in_specs=in_specs,
        out_specs=out_specs,
        compiler_params=pltpu.CompilerParams(
            dimension_semantics=("parallel",),       # megacore-shardable batch
            vmem_limit_bytes=32 * 1024 * 1024,       # safe on v5e/v6e/v7x
        ),
    )(*inputs)

    # (B, n_embeds*d_out) -> (B, n_embeds, d_out) is a free row-major reshape.
    out_new = out_flat[:B].reshape(B, n_embeds, d_out)
    residual = res_flat[:B].reshape(B, n_embeds, d_out)
    attn = attn[:B]
    if n_embeds == 1:   # torch squeezes the head dim when n_head == 1
        out_new = out_new[:, 0, :]
        residual = residual[:, 0, :]
    return out_new, attn, residual


# ----------------------------------------------------------------------------
# Pure-JAX reference mirroring the PyTorch forward
# ----------------------------------------------------------------------------
def pienet_reference(out, x, p, n_embeds, pad_mask=None, l2_normalize=True):
    h = jnp.tanh(x @ p["w1"])
    logits = h @ p["w2"]                                   # (B, L, H)
    if pad_mask is not None:
        logits = jnp.where(pad_mask[:, :, None], -jnp.inf, logits)
    attn = jax.nn.softmax(logits, axis=1)
    pooled = jnp.einsum("blh,bld->bhd", attn, x)           # (B, H, d_in)
    res = jax.nn.sigmoid(pooled @ p["fc_w"] + p["fc_b"])   # (B, H, d_out)
    o = out[:, None, :] + res
    mu = o.mean(-1, keepdims=True)
    var = ((o - mu) ** 2).mean(-1, keepdims=True)
    o = (o - mu) / jnp.sqrt(var + 1e-5)
    o = o * p["ln_g"] + p["ln_b"]
    if l2_normalize:
        o = o / jnp.sqrt(jnp.sum(o * o, axis=-1, keepdims=True))
    if n_embeds == 1:
        o = o[:, 0]
        res = res[:, 0]
    return o, attn, res


def get_pad_mask(max_length, lengths):
    """True on padded positions (torch get_pad_mask with set_pad_to_one=True)."""
    ind = jnp.arange(max_length)[None, :]
    return ind >= lengths[:, None]


def xavier_uniform(key, fan_in, fan_out):
    bound = float(np.sqrt(6.0 / (fan_in + fan_out)))
    return jax.random.uniform(key, (fan_in, fan_out), jnp.float32, -bound, bound)


# ----------------------------------------------------------------------------
# Demo / self-test
# ----------------------------------------------------------------------------
if __name__ == "__main__":
    key = jax.random.PRNGKey(0)

    def make_params(k, d_in, d_h, d_out, n_embeds):
        k1, k2, k3 = jax.random.split(k, 3)
        return {
            "w1": xavier_uniform(k1, d_in, d_h),        # attention.w_1 (no bias)
            "w2": xavier_uniform(k2, d_h, n_embeds),    # attention.w_2 (no bias)
            "fc_w": xavier_uniform(k3, d_in, d_out),    # PIENet.fc (bias = 0)
            "fc_b": jnp.zeros((d_out,), jnp.float32),
            "ln_g": jnp.ones((d_out,), jnp.float32),    # LayerNorm weight
            "ln_b": jnp.zeros((d_out,), jnp.float32),   # LayerNorm bias
        }

    def check(name, got, want, atol=1e-5, rtol=1e-5):
        g, w = np.asarray(got), np.asarray(want)
        if not np.allclose(g, w, atol=atol, rtol=rtol):
            raise AssertionError(
                f"{name} mismatch (max abs err {np.max(np.abs(g - w)):.3e})")

    # --- config 1: small shapes (B=2, L=8, d_in=32, d_h=16, d_out=32, H=2) ---
    B, L, d_in, d_h, d_out, n_embeds = 2, 8, 32, 16, 32, 2
    k1, k2, k3, key = jax.random.split(key, 4)
    params = make_params(k1, d_in, d_h, d_out, n_embeds)
    x = jax.random.normal(k2, (B, L, d_in), jnp.float32)     # wemb_out
    out = jax.random.normal(k3, (B, d_out), jnp.float32)     # rnn_out
    lengths = jnp.array([8, 5], jnp.int32)
    pad_mask = get_pad_mask(L, lengths)

    got = pienet_forward(out, x, params, n_embeds, pad_mask=pad_mask)
    jax.block_until_ready(got)
    want = pienet_reference(out, x, params, n_embeds, pad_mask=pad_mask)
    check("out (masked)", got[0], want[0])
    check("attn (masked)", got[1], want[1])
    check("residual (masked)", got[2], want[2])

    # --- config 1b: no-mask specialisation (mask input compiled away) -------
    got = pienet_forward(out, x, params, n_embeds, pad_mask=None)
    jax.block_until_ready(got)
    want = pienet_reference(out, x, params, n_embeds, pad_mask=None)
    check("out (no mask)", got[0], want[0])
    check("attn (no mask)", got[1], want[1])
    check("residual (no mask)", got[2], want[2])

    # --- config 2: batch > block -> batch padding + multi-step grid ---------
    B2 = 20
    k1, k2, k3, k4, key = jax.random.split(key, 5)
    params2 = make_params(k1, d_in, d_h, d_out, n_embeds)
    x2 = jax.random.normal(k2, (B2, L, d_in), jnp.float32)
    out2 = jax.random.normal(k3, (B2, d_out), jnp.float32)
    lengths2 = jax.random.randint(k4, (B2,), 1, L + 1)
    pad_mask2 = get_pad_mask(L, lengths2)

    got = pienet_forward(out2, x2, params2, n_embeds, pad_mask=pad_mask2,
                         block_b=8)
    jax.block_until_ready(got)
    want = pienet_reference(out2, x2, params2, n_embeds, pad_mask=pad_mask2)
    check("out (tiled)", got[0], want[0])
    check("attn (tiled)", got[1], want[1])
    check("residual (tiled)", got[2], want[2])

    print("KERNEL_OK")
</pallas_src>

<mosaic_0001>
module attributes {stable_mosaic.version = 11 : i64} {
  func.func @kernel(%arg0: i32, %arg1: memref<2x8x32xf32, #tpu.memory_space<vmem>>, %arg2: memref<2x32xf32, #tpu.memory_space<vmem>>, %arg3: memref<2x8x1xf32, #tpu.memory_space<vmem>>, %arg4: memref<32x16xf32, #tpu.memory_space<vmem>>, %arg5: memref<16x2xf32, #tpu.memory_space<vmem>>, %arg6: memref<32x32xf32, #tpu.memory_space<vmem>>, %arg7: memref<1x32xf32, #tpu.memory_space<vmem>>, %arg8: memref<1x32xf32, #tpu.memory_space<vmem>>, %arg9: memref<1x32xf32, #tpu.memory_space<vmem>>, %arg10: memref<2x64xf32, #tpu.memory_space<vmem>>, %arg11: memref<2x8x2xf32, #tpu.memory_space<vmem>>, %arg12: memref<2x64xf32, #tpu.memory_space<vmem>>) attributes {dimension_semantics = [#tpu.dimension_semantics<parallel>], iteration_bounds = array<i64: 1>, scalar_prefetch = 0 : i64, scratch_operands = 0 : i64, tpu.core_type = #tpu.core_type<tc>, window_params = [{transform_indices = @transform_0, window_bounds = array<i64: 2, 8, 32>}, {transform_indices = @transform_1, window_bounds = array<i64: 2, 32>}, {transform_indices = @transform_2, window_bounds = array<i64: 2, 8, 1>}, {pipeline_mode = #tpu.pipeline_mode<synchronous>, transform_indices = @transform_3, window_bounds = array<i64: 32, 16>}, {pipeline_mode = #tpu.pipeline_mode<synchronous>, transform_indices = @transform_4, window_bounds = array<i64: 16, 2>}, {pipeline_mode = #tpu.pipeline_mode<synchronous>, transform_indices = @transform_5, window_bounds = array<i64: 32, 32>}, {pipeline_mode = #tpu.pipeline_mode<synchronous>, transform_indices = @transform_6, window_bounds = array<i64: 1, 32>}, {pipeline_mode = #tpu.pipeline_mode<synchronous>, transform_indices = @transform_7, window_bounds = array<i64: 1, 32>}, {pipeline_mode = #tpu.pipeline_mode<synchronous>, transform_indices = @transform_8, window_bounds = array<i64: 1, 32>}, {transform_indices = @transform_9, window_bounds = array<i64: 2, 64>}, {transform_indices = @transform_10, window_bounds = array<i64: 2, 8, 2>}, {transform_indices = @transform_11, window_bounds = array<i64: 2, 64>}]} {
    %c0 = arith.constant 0 : index
    %c0_0 = arith.constant 0 : index
    %c0_1 = arith.constant 0 : index
    %0 = vector.load %arg1[%c0, %c0_0, %c0_1] : memref<2x8x32xf32, #tpu.memory_space<vmem>>, vector<2x8x32xf32>
    %1 = vector.shape_cast %0 : vector<2x8x32xf32> to vector<16x32xf32>
    %c0_2 = arith.constant 0 : index
    %c0_3 = arith.constant 0 : index
    %2 = vector.load %arg4[%c0_2, %c0_3] : memref<32x16xf32, #tpu.memory_space<vmem>>, vector<32x16xf32>
    %cst = arith.constant dense<0.000000e+00> : vector<16x16xf32>
    %3 = tpu.matmul %1, %2, %cst {dimension_numbers = #tpu.dot_dimension_numbers<[1], [0], [0], [1], [0, 0, 1, 1], [], []>} : vector<16x32xf32>, vector<32x16xf32>, vector<16x16xf32> -> vector<16x16xf32>
    %4 = math.tanh %3 : vector<16x16xf32>
    %c0_4 = arith.constant 0 : index
    %c0_5 = arith.constant 0 : index
    %5 = vector.load %arg5[%c0_4, %c0_5] : memref<16x2xf32, #tpu.memory_space<vmem>>, vector<16x2xf32>
    %cst_6 = arith.constant dense<0.000000e+00> : vector<16x2xf32>
    %6 = tpu.matmul %4, %5, %cst_6 {dimension_numbers = #tpu.dot_dimension_numbers<[1], [0], [0], [1], [0, 0, 1, 1], [], []>} : vector<16x16xf32>, vector<16x2xf32>, vector<16x2xf32> -> vector<16x2xf32>
    %7 = vector.shape_cast %6 : vector<16x2xf32> to vector<2x8x2xf32>
    %c0_7 = arith.constant 0 : index
    %c0_8 = arith.constant 0 : index
    %c0_9 = arith.constant 0 : index
    %8 = vector.load %arg3[%c0_7, %c0_8, %c0_9] : memref<2x8x1xf32, #tpu.memory_space<vmem>>, vector<2x8x1xf32>
    %9 = vector.broadcast %8 : vector<2x8x1xf32> to vector<2x8x2xf32>
    %10 = arith.addf %7, %9 : vector<2x8x2xf32>
    %cst_10 = arith.constant dense<0xFF800000> : vector<2x2xf32>
    %11 = vector.multi_reduction <maximumf>, %10, %cst_10 [1] : vector<2x8x2xf32> to vector<2x2xf32>
    %12 = vector.shape_cast %11 : vector<2x2xf32> to vector<2x1x2xf32>
    %13 = vector.broadcast %12 : vector<2x1x2xf32> to vector<2x8x2xf32>
    %14 = arith.subf %10, %13 : vector<2x8x2xf32>
    %15 = math.exp %14 : vector<2x8x2xf32>
    %cst_11 = arith.constant dense<0.000000e+00> : vector<2x2xf32>
    %16 = vector.multi_reduction <add>, %15, %cst_11 [1] : vector<2x8x2xf32> to vector<2x2xf32>
    %17 = vector.shape_cast %16 : vector<2x2xf32> to vector<2x1x2xf32>
    %18 = vector.broadcast %17 : vector<2x1x2xf32> to vector<2x8x2xf32>
    %19 = arith.divf %15, %18 : vector<2x8x2xf32>
    %c0_12 = arith.constant 0 : index
    %c0_13 = arith.constant 0 : index
    %c0_14 = arith.constant 0 : index
    %20 = vector.load %arg11[%c0_12, %c0_13, %c0_14] : memref<2x8x2xf32, #tpu.memory_space<vmem>>, vector<2x8x2xf32>
    tpu.vector_store %arg11[%c0_12, %c0_13, %c0_14], %19 {strides = array<i32>} : memref<2x8x2xf32, #tpu.memory_space<vmem>>, vector<2x8x2xf32>,
    %c0_15 = arith.constant 0 : index
    %c0_16 = arith.constant 0 : index
    %21 = vector.load %arg2[%c0_15, %c0_16] : memref<2x32xf32, #tpu.memory_space<vmem>>, vector<2x32xf32>
    %c0_17 = arith.constant 0 : index
    %c0_18 = arith.constant 0 : index
    %22 = vector.load %arg6[%c0_17, %c0_18] : memref<32x32xf32, #tpu.memory_space<vmem>>, vector<32x32xf32>
    %c0_19 = arith.constant 0 : index
    %c0_20 = arith.constant 0 : index
    %23 = vector.load %arg7[%c0_19, %c0_20] : memref<1x32xf32, #tpu.memory_space<vmem>>, vector<1x32xf32>
    %c0_21 = arith.constant 0 : index
    %c0_22 = arith.constant 0 : index
    %24 = vector.load %arg8[%c0_21, %c0_22] : memref<1x32xf32, #tpu.memory_space<vmem>>, vector<1x32xf32>
    %c0_23 = arith.constant 0 : index
    %c0_24 = arith.constant 0 : index
    %25 = vector.load %arg9[%c0_23, %c0_24] : memref<1x32xf32, #tpu.memory_space<vmem>>, vector<1x32xf32>
    %26 = vector.extract_strided_slice %19 {offsets = [0, 0, 0], sizes = [2, 8, 1], strides = [1, 1, 1]} : vector<2x8x2xf32> to vector<2x8x1xf32>
    %27 = vector.broadcast %26 : vector<2x8x1xf32> to vector<2x8x32xf32>
    %28 = arith.mulf %27, %0 : vector<2x8x32xf32>
    %cst_25 = arith.constant dense<0.000000e+00> : vector<2x32xf32>
    %29 = vector.multi_reduction <add>, %28, %cst_25 [1] : vector<2x8x32xf32> to vector<2x32xf32>
    %cst_26 = arith.constant dense<0.000000e+00> : vector<2x32xf32>
    %30 = tpu.matmul %29, %22, %cst_26 {dimension_numbers = #tpu.dot_dimension_numbers<[1], [0], [0], [1], [0, 0, 1, 1], [], []>} : vector<2x32xf32>, vector<32x32xf32>, vector<2x32xf32> -> vector<2x32xf32>
    %31 = vector.broadcast %23 : vector<1x32xf32> to vector<2x32xf32>
    %32 = arith.addf %30, %31 : vector<2x32xf32>
    %33 = arith.negf %32 : vector<2x32xf32>
    %34 = math.exp %33 : vector<2x32xf32>
    %cst_27 = arith.constant 1.000000e+00 : f32
    %35 = vector.broadcast %cst_27 : f32 to vector<2x32xf32>
    %36 = arith.addf %35, %34 : vector<2x32xf32>
    %37 = arith.divf %35, %36 : vector<2x32xf32>
    %38 = arith.addf %21, %37 : vector<2x32xf32>
    %cst_28 = arith.constant dense<0.000000e+00> : vector<2xf32>
    %39 = vector.multi_reduction <add>, %38, %cst_28 [1] : vector<2x32xf32> to vector<2xf32>
    %40 = vector.shape_cast %39 : vector<2xf32> to vector<2x1xf32>
    %cst_29 = arith.constant 3.200000e+01 : f32
    %41 = vector.broadcast %cst_29 : f32 to vector<2x1xf32>
    %42 = arith.divf %40, %41 : vector<2x1xf32>
    %43 = vector.broadcast %42 : vector<2x1xf32> to vector<2x32xf32>
    %44 = arith.subf %38, %43 : vector<2x32xf32>
    %45 = arith.mulf %44, %44 : vector<2x32xf32>
    %cst_30 = arith.constant dense<0.000000e+00> : vector<2xf32>
    %46 = vector.multi_reduction <add>, %45, %cst_30 [1] : vector<2x32xf32> to vector<2xf32>
    %47 = vector.shape_cast %46 : vector<2xf32> to vector<2x1xf32>
    %cst_31 = arith.constant 3.200000e+01 : f32
    %48 = vector.broadcast %cst_31 : f32 to vector<2x1xf32>
    %49 = arith.divf %47, %48 : vector<2x1xf32>
    %50 = vector.broadcast %42 : vector<2x1xf32> to vector<2x32xf32>
    %51 = arith.subf %38, %50 : vector<2x32xf32>
    %cst_32 = arith.constant 9.99999974E-6 : f32
    %52 = vector.broadcast %cst_32 : f32 to vector<2x1xf32>
    %53 = arith.addf %49, %52 : vector<2x1xf32>
    %54 = math.rsqrt %53 : vector<2x1xf32>
    %55 = vector.broadcast %54 : vector<2x1xf32> to vector<2x32xf32>
    %56 = arith.mulf %51, %55 : vector<2x32xf32>
    %57 = vector.broadcast %24 : vector<1x32xf32> to vector<2x32xf32>
    %58 = arith.mulf %56, %57 : vector<2x32xf32>
    %59 = vector.broadcast %25 : vector<1x32xf32> to vector<2x32xf32>
    %60 = arith.addf %58, %59 : vector<2x32xf32>
    %61 = arith.mulf %60, %60 : vector<2x32xf32>
    %cst_33 = arith.constant dense<0.000000e+00> : vector<2xf32>
    %62 = vector.multi_reduction <add>, %61, %cst_33 [1] : vector<2x32xf32> to vector<2xf32>
    %63 = vector.shape_cast %62 : vector<2xf32> to vector<2x1xf32>
    %64 = math.rsqrt %63 : vector<2x1xf32>
    %65 = vector.broadcast %64 : vector<2x1xf32> to vector<2x32xf32>
    %66 = arith.mulf %60, %65 : vector<2x32xf32>
    %c0_34 = arith.constant 0 : index
    %c0_35 = arith.constant 0 : index
    %67 = vector.load %arg12[%c0_34, %c0_35] : memref<2x64xf32, #tpu.memory_space<vmem>>, vector<2x32xf32>
    tpu.vector_store %arg12[%c0_34, %c0_35], %37 {strides = array<i32>} : memref<2x64xf32, #tpu.memory_space<vmem>>, vector<2x32xf32>,
    %c0_36 = arith.constant 0 : index
    %c0_37 = arith.constant 0 : index
    %68 = vector.load %arg10[%c0_36, %c0_37] : memref<2x64xf32, #tpu.memory_space<vmem>>, vector<2x32xf32>
    tpu.vector_store %arg10[%c0_36, %c0_37], %66 {strides = array<i32>} : memref<2x64xf32, #tpu.memory_space<vmem>>, vector<2x32xf32>,
    %69 = vector.extract_strided_slice %19 {offsets = [0, 0, 1], sizes = [2, 8, 1], strides = [1, 1, 1]} : vector<2x8x2xf32> to vector<2x8x1xf32>
    %70 = vector.broadcast %69 : vector<2x8x1xf32> to vector<2x8x32xf32>
    %71 = arith.mulf %70, %0 : vector<2x8x32xf32>
    %cst_38 = arith.constant dense<0.000000e+00> : vector<2x32xf32>
    %72 = vector.multi_reduction <add>, %71, %cst_38 [1] : vector<2x8x32xf32> to vector<2x32xf32>
    %cst_39 = arith.constant dense<0.000000e+00> : vector<2x32xf32>
    %73 = tpu.matmul %72, %22, %cst_39 {dimension_numbers = #tpu.dot_dimension_numbers<[1], [0], [0], [1], [0, 0, 1, 1], [], []>} : vector<2x32xf32>, vector<32x32xf32>, vector<2x32xf32> -> vector<2x32xf32>
    %74 = vector.broadcast %23 : vector<1x32xf32> to vector<2x32xf32>
    %75 = arith.addf %73, %74 : vector<2x32xf32>
    %76 = arith.negf %75 : vector<2x32xf32>
    %77 = math.exp %76 : vector<2x32xf32>
    %cst_40 = arith.constant 1.000000e+00 : f32
    %78 = vector.broadcast %cst_40 : f32 to vector<2x32xf32>
    %79 = arith.addf %78, %77 : vector<2x32xf32>
    %80 = arith.divf %78, %79 : vector<2x32xf32>
    %81 = arith.addf %21, %80 : vector<2x32xf32>
    %cst_41 = arith.constant dense<0.000000e+00> : vector<2xf32>
    %82 = vector.multi_reduction <add>, %81, %cst_41 [1] : vector<2x32xf32> to vector<2xf32>
    %83 = vector.shape_cast %82 : vector<2xf32> to vector<2x1xf32>
    %cst_42 = arith.constant 3.200000e+01 : f32
    %84 = vector.broadcast %cst_42 : f32 to vector<2x1xf32>
    %85 = arith.divf %83, %84 : vector<2x1xf32>
    %86 = vector.broadcast %85 : vector<2x1xf32> to vector<2x32xf32>
    %87 = arith.subf %81, %86 : vector<2x32xf32>
    %88 = arith.mulf %87, %87 : vector<2x32xf32>
    %cst_43 = arith.constant dense<0.000000e+00> : vector<2xf32>
    %89 = vector.multi_reduction <add>, %88, %cst_43 [1] : vector<2x32xf32> to vector<2xf32>
    %90 = vector.shape_cast %89 : vector<2xf32> to vector<2x1xf32>
    %cst_44 = arith.constant 3.200000e+01 : f32
    %91 = vector.broadcast %cst_44 : f32 to vector<2x1xf32>
    %92 = arith.divf %90, %91 : vector<2x1xf32>
    %93 = vector.broadcast %85 : vector<2x1xf32> to vector<2x32xf32>
    %94 = arith.subf %81, %93 : vector<2x32xf32>
    %cst_45 = arith.constant 9.99999974E-6 : f32
    %95 = vector.broadcast %cst_45 : f32 to vector<2x1xf32>
    %96 = arith.addf %92, %95 : vector<2x1xf32>
    %97 = math.rsqrt %96 : vector<2x1xf32>
    %98 = vector.broadcast %97 : vector<2x1xf32> to vector<2x32xf32>
    %99 = arith.mulf %94, %98 : vector<2x32xf32>
    %100 = vector.broadcast %24 : vector<1x32xf32> to vector<2x32xf32>
    %101 = arith.mulf %99, %100 : vector<2x32xf32>
    %102 = vector.broadcast %25 : vector<1x32xf32> to vector<2x32xf32>
    %103 = arith.addf %101, %102 : vector<2x32xf32>
    %104 = arith.mulf %103, %103 : vector<2x32xf32>
    %cst_46 = arith.constant dense<0.000000e+00> : vector<2xf32>
    %105 = vector.multi_reduction <add>, %104, %cst_46 [1] : vector<2x32xf32> to vector<2xf32>
    %106 = vector.shape_cast %105 : vector<2xf32> to vector<2x1xf32>
    %107 = math.rsqrt %106 : vector<2x1xf32>
    %108 = vector.broadcast %107 : vector<2x1xf32> to vector<2x32xf32>
    %109 = arith.mulf %103, %108 : vector<2x32xf32>
    %c0_47 = arith.constant 0 : index
    %c32 = arith.constant 32 : index
    %110 = vector.load %arg12[%c0_47, %c32] : memref<2x64xf32, #tpu.memory_space<vmem>>, vector<2x32xf32>
    tpu.vector_store %arg12[%c0_47, %c32], %80 {strides = array<i32>} : memref<2x64xf32, #tpu.memory_space<vmem>>, vector<2x32xf32>,
    %c0_48 = arith.constant 0 : index
    %c32_49 = arith.constant 32 : index
    %111 = vector.load %arg10[%c0_48, %c32_49] : memref<2x64xf32, #tpu.memory_space<vmem>>, vector<2x32xf32>
    tpu.vector_store %arg10[%c0_48, %c32_49], %109 {strides = array<i32>} : memref<2x64xf32, #tpu.memory_space<vmem>>, vector<2x32xf32>,
    return
  }
  func.func @transform_0(%arg0: i32) -> (i32, i32, i32) {
    %c0_i32 = arith.constant 0 : i32
    %c0_i32_0 = arith.constant 0 : i32
    %c0_i32_1 = arith.constant 0 : i32
    return %arg0, %c0_i32, %c0_i32_0 : i32, i32, i32
  }
  func.func @transform_1(%arg0: i32) -> (i32, i32) {
    %c0_i32 = arith.constant 0 : i32
    %c0_i32_0 = arith.constant 0 : i32
    return %arg0, %c0_i32 : i32, i32
  }
  func.func @transform_2(%arg0: i32) -> (i32, i32, i32) {
    %c0_i32 = arith.constant 0 : i32
    %c0_i32_0 = arith.constant 0 : i32
    %c0_i32_1 = arith.constant 0 : i32
    return %arg0, %c0_i32, %c0_i32_0 : i32, i32, i32
  }
  func.func @transform_3(%arg0: i32) -> (i32, i32) {
    %c0_i32 = arith.constant 0 : i32
    %c0_i32_0 = arith.constant 0 : i32
    %c0_i32_1 = arith.constant 0 : i32
    return %c0_i32, %c0_i32_0 : i32, i32
  }
  func.func @transform_4(%arg0: i32) -> (i32, i32) {
    %c0_i32 = arith.constant 0 : i32
    %c0_i32_0 = arith.constant 0 : i32
    %c0_i32_1 = arith.constant 0 : i32
    return %c0_i32, %c0_i32_0 : i32, i32
  }
  func.func @transform_5(%arg0: i32) -> (i32, i32) {
    %c0_i32 = arith.constant 0 : i32
    %c0_i32_0 = arith.constant 0 : i32
    %c0_i32_1 = arith.constant 0 : i32
    return %c0_i32, %c0_i32_0 : i32, i32
  }
  func.func @transform_6(%arg0: i32) -> (i32, i32) {
    %c0_i32 = arith.constant 0 : i32
    %c0_i32_0 = arith.constant 0 : i32
    %c0_i32_1 = arith.constant 0 : i32
    return %c0_i32, %c0_i32_0 : i32, i32
  }
  func.func @transform_7(%arg0: i32) -> (i32, i32) {
    %c0_i32 = arith.constant 0 : i32
    %c0_i32_0 = arith.constant 0 : i32
    %c0_i32_1 = arith.constant 0 : i32
    return %c0_i32, %c0_i32_0 : i32, i32
  }
  func.func @transform_8(%arg0: i32) -> (i32, i32) {
    %c0_i32 = arith.constant 0 : i32
    %c0_i32_0 = arith.constant 0 : i32
    %c0_i32_1 = arith.constant 0 : i32
    return %c0_i32, %c0_i32_0 : i32, i32
  }
  func.func @transform_9(%arg0: i32) -> (i32, i32) {
    %c0_i32 = arith.constant 0 : i32
    %c0_i32_0 = arith.constant 0 : i32
    return %arg0, %c0_i32 : i32, i32
  }
  func.func @transform_10(%arg0: i32) -> (i32, i32, i32) {
    %c0_i32 = arith.constant 0 : i32
    %c0_i32_0 = arith.constant 0 : i32
    %c0_i32_1 = arith.constant 0 : i32
    return %arg0, %c0_i32, %c0_i32_0 : i32, i32, i32
  }
  func.func @transform_11(%arg0: i32) -> (i32, i32) {
    %c0_i32 = arith.constant 0 : i32
    %c0_i32_0 = arith.constant 0 : i32
    return %arg0, %c0_i32 : i32, i32
  }
}

</mosaic_0001>

<bundles_post_ra>
// kernel: tpu_custom_call.1
= control target key start
LH: loop header
LB: loop body
LE: loop exit
PB: predicated region body
PF: predicated region fallthrough
CT: control target
= control target key end

     0   :  { %17 = vsyncpa [#allocation3], 0  ;;  %s754_s0 = inlined_call_operand.vmem [shape: f32[2,8,32], index: 0, kind: input, shape index: {}]   ;;  %s755_s1 = inlined_call_operand.vmem [shape: f32[2,32], index: 1, kind: input, shape index: {}]   ;;  %s756_s2 = inlined_call_operand.vmem [shape: f32[2,8,1], index: 2, kind: input, shape index: {}]   ;;  %s757_s3 = inlined_call_operand.vmem [shape: f32[32,16], index: 3, kind: input, shape index: {}]   ;;  %s758_s4 = inlined_call_operand.vmem [shape: f32[16,2], index: 4, kind: input, shape index: {}]   ;;  %s759_s5 = inlined_call_operand.vmem [shape: f32[32,32], index: 5, kind: input, shape index: {}]   ;;  %s760_s6 = inlined_call_operand.vmem [shape: f32[1,32], index: 6, kind: input, shape index: {}]   ;;  %s761_s7 = inlined_call_operand.vmem [shape: f32[1,32], index: 7, kind: input, shape index: {}]   ;;  %s762_s8 = inlined_call_operand.vmem [shape: f32[1,32], index: 8, kind: input, shape index: {}]   ;;  %s763_s9 = inlined_call_operand.hbm [shape: f32[2,64], index: 9, kind: output, shape index: {0}]   ;;  %s764_s10 = inlined_call_operand.vmem [shape: f32[2,8,2], index: 10, kind: output, shape index: {1}]   ;;  %s765_s11 = inlined_call_operand.hbm [shape: f32[2,64], index: 11, kind: output, shape index: {2}]  }
   0x1   :  { %v42_v0 = vld [vmem:[%s757_s3 + $0x18] sm:$0xff]  ;;  %v41_v1 = vld [vmem:[%s757_s3 + $0x10] sm:$0xff]  ;;  %v40_v2 = vld [vmem:[%s757_s3 + $0x8] sm:$0xff] }
   0x2   :  { %62 = vmatpush.msra.mxu0 %v42_v0 }
   0x4   :  { %63 = vmatpush.msra.mxu0 %v41_v1 }
   0x5   :  { %18 = vsyncpa [#allocation5], 0  ;;  %v39_v3 = vld [vmem:[%s757_s3] sm:$0xff]  ;;  %vm43_vm0 = vcmask 261120   ;;  %v672_v5 = vld [vmem:[%s754_s0 + $0x8] sm:$0xff]  ;;  %v584_v9 = vmov 0  }
   0x6   :  { %64 = vmatpush.msra.mxu0 %v40_v2  ;;  %v665_v4 = vld [vmem:[%s754_s0] sm:$0xff]  ;;  %v76_v6 = vld [vmem:[%s758_s4 + $0x8] sm:$0xff]  ;;  %495 = vset.pattern.permute.xlu0 %v584_v9  ;;  %vm77_vm1 = vcmask 130048   ;;  %vm121_vm2 = vcmask 15360   ;;  %v585_v33 = vmov 1   ;;  %vm227_vm11 = vcmask 1041409  }
   0x7   :  { %v75_v7 = vld [vmem:[%s758_s4] sm:$0xff]  ;;  %98 = vmatpush.msra.mxu1 %v76_v6  ;;  %497 = vset.pattern.permute.xlu2 %v584_v9  ;;  %v108_v10 = vld [vmem:[%s756_s2 + $0x8] sm:$0xff]  ;;  %vm271_vm15 = vcmask 254976   ;;  %s465_s13 = sshll.u32 %s765_s11, 4  ;;  %s589_s11 = smov [#allocation2]   ;;  %s466_s13 = int_to_ptr.hbm [resolvable:$true] %s465_s13 }
   0x8   :  { %65 = vmatpush.msra.mxu0 %v39_v3  ;;  %v107_v8 = vld [vmem:[%s756_s2] sm:$0xff]  ;;  %496 = vset.pattern.permute.xlu1 %v585_v33  ;;  %s450_s14 = sshll.u32 %s589_s11, 4  ;;  %s452_s2 = sshll.u32 %s763_s9, 4  ;;  %s451_s14 = int_to_ptr.vmem [resolvable:$true] %s450_s14  ;;  %s453_s2 = int_to_ptr.hbm [resolvable:$true] %s452_s2 }
   0x9   :  { %481 = vmatmul.msk.f32.vlgmr.msra.gmra.mxu0 %vm43_vm0, %v665_v4  ;;  %99 = vmatpush.msra.mxu1 %v75_v7 }
   0xa   :  { %111 = vperm.xlu0 %495, %v107_v8  }
  0x11   :  { %482 = vmatmul.msk.f32.gmra.mxu0 %vm43_vm0, %v672_v5 }
  0x12   :  { %116 = vperm.xlu0 %495, %v108_v10  }
  0x1a   :  { %498 = vset.pattern.permute.xlu0 %v585_v33 }
  0x7c   :  { %v112_v15 = vpop.permute.xlu0 %111 }
  0x84   :  { %v117_v21 = vpop.permute.xlu0 %116 }
  0x86   :  { %v67_v11 = vpop.f32.mrf.mxu0 }
  0x87   :  { %502 = vtanh.f32 %v67_v11 }
  0x8d   :  { %v503_v12 = vpop.eup %502 }
  0x8e   :  { %v70_v13 = vpop.f32.mrf.mxu0  ;;  %483 = vmatmul.msk.f32.vlgmr.msra.gmra.mxu1 %vm77_vm1, %v503_v12 }
  0x8f   :  { %504 = vtanh.f32 %v70_v13 }
  0x95   :  { %v505_v14 = vpop.eup %504 }
  0x96   :  { %484 = vmatmul.msk.f32.gmra.mxu1 %vm77_vm1, %v505_v14 }
 0x10b   :  { %v101_v16 = vpop.f32.mrf.mxu1 }
 0x10c   :  { %v119_v17 = vadd.f32 %v112_v15, %v101_v16  ;;  %v192_v16 = vld [vmem:[%s759_s5 + $0x18] sm:$0xff] }
 0x10d   :  { %243 = vmatpush.msra.mxu2 %v192_v16  ;;  %367 = vmatpush.msra.mxu3 %v192_v16 }
 0x10e   :  { %v122_v18 = vsel %vm121_vm2, %v119_v17, -inf }
 0x10f   :  { %v123_v19 = vrot.slane %v122_v18, 4 }
 0x111   :  { %v124_v20 = vmax.f32 %v122_v18, %v123_v19  ;;  %v190_v18 = vld [vmem:[%s759_s5 + $0x8] sm:$0xff]  ;;  %v189_v19 = vld [vmem:[%s759_s5] sm:$0xff] }
 0x113   :  { %v125_v22 = vrot.slane %v124_v20, 2  ;;  %v104_v23 = vpop.f32.mrf.mxu1 }
 0x114   :  { %v120_v24 = vadd.f32 %v117_v21, %v104_v23 }
 0x115   :  { %v126_v25 = vmax.f32 %v124_v20, %v125_v22 }
 0x116   :  { %v129_v26 = vsel %vm121_vm2, %v120_v24, -inf }
 0x117   :  { %v127_v27 = vrot.slane %v126_v25, 1  ;;  %v130_v28 = vrot.slane %v129_v26, 4 }
 0x119   :  { %v128_v29 = vmax.f32 %v126_v25, %v127_v27  ;;  %v131_v30 = vmax.f32 %v129_v26, %v130_v28 }
 0x11b   :  { %v136_v31 = vsub.f32 %v119_v17, %v128_v29  ;;  %v132_v32 = vrot.slane %v131_v30, 2  ;;  %v191_v17 = vld [vmem:[%s759_s5 + $0x10] sm:$0xff] }
 0x11c   :  { %244 = vmatpush.msra.mxu2 %v191_v17  ;;  %368 = vmatpush.msra.mxu3 %v191_v17 }
 0x11d   :  { %v138_v34 = vmul.f32 1.442695, %v136_v31  ;;  %v133_v35 = vmax.f32 %v131_v30, %v132_v32 }
 0x11e   :  { %245 = vmatpush.msra.mxu2 %v190_v18  ;;  %369 = vmatpush.msra.mxu3 %v190_v18 }
 0x11f   :  { %506 = vpow2.f32 %v138_v34  ;;  %v134_v36 = vrot.slane %v133_v35, 1 }
 0x120   :  { %246 = vmatpush.msra.mxu2 %v189_v19  ;;  %370 = vmatpush.msra.mxu3 %v189_v19 }
 0x121   :  { %v135_v37 = vmax.f32 %v133_v35, %v134_v36 }
 0x123   :  { %v137_v38 = vsub.f32 %v120_v24, %v135_v37 }
 0x125   :  { %v507_v39 = vpop.eup %506  ;;  %v140_v40 = vmul.f32 1.442695, %v137_v38 }
 0x126   :  { %v142_v41 = vsel %vm121_vm2, %v507_v39, 0.0 }
 0x127   :  { %v143_v42 = vrot.slane %v142_v41, 4  ;;  %508 = vpow2.f32 %v140_v40 }
 0x129   :  { %v144_v43 = vadd.f32 %v143_v42, %v142_v41 }
 0x12b   :  { %v145_v44 = vrot.slane %v144_v43, 2 }
 0x12d   :  { %v509_v45 = vpop.eup %508  ;;  %v146_v46 = vadd.f32 %v145_v44, %v144_v43 }
 0x12e   :  { %v149_v47 = vsel %vm121_vm2, %v509_v45, 0.0 }
 0x12f   :  { %v147_v48 = vrot.slane %v146_v46, 1  ;;  %v150_v49 = vrot.slane %v149_v47, 4 }
 0x131   :  { %v148_v50 = vadd.f32 %v147_v48, %v146_v46  ;;  %v151_v51 = vadd.f32 %v150_v49, %v149_v47 }
 0x133   :  { %510 = vrcp.f32 %v148_v50  ;;  %v152_v52 = vrot.slane %v151_v51, 2  ;;  %v167_v59 = vand.u32 2147483648, %v148_v50  ;;  %v165_v61 = vand.u32 2147483647, %v148_v50 }
 0x134   :  { %vm161_vm4 = vweird.f32 %v148_v50 }
 0x135   :  { %v153_v53 = vadd.f32 %v152_v52, %v151_v51  ;;  %v168_v0 = vor.u32 1.1754944e-38, %v167_v59  ;;  %vm166_vm6 = vcmp.eq.f32.partialorder %v165_v61, 8.507059e+37 }
 0x137   :  { %v154_v54 = vrot.slane %v153_v53, 1 }
 0x139   :  { %v511_v55 = vpop.eup %510  ;;  %v155_v56 = vadd.f32 %v154_v54, %v153_v53 }
 0x13a   :  { %v157_v57 = vmul.f32 %v511_v55, %v148_v50  ;;  %vm162_vm3 = vweird.f32 %v511_v55 }
 0x13b   :  { %512 = vrcp.f32 %v155_v56  ;;  %vm163_vm5 = vmor %vm161_vm4, %vm162_vm3  ;;  %v182_v8 = vand.u32 2147483648, %v155_v56  ;;  %v180_v10 = vand.u32 2147483647, %v155_v56  ;;  %vm176_vm8 = vweird.f32 %v155_v56 }
 0x13c   :  { %v158_v58 = vsub.f32 1.0, %v157_v57 }
 0x13d   :  { %v183_v12 = vor.u32 1.1754944e-38, %v182_v8  ;;  %vm181_vm10 = vcmp.eq.f32.partialorder %v180_v10, 8.507059e+37  ;;  %v188_v10 = vld [vmem:[%s755_s1] sm:$0x3]  ;;  %s587_s1 = smov 32  }
 0x13e   :  { %v159_v60 = vmul.f32 %v511_v55, %v158_v58 }
 0x140   :  { %v160_v62 = vadd.f32 %v511_v55, %v159_v60 }
 0x141   :  { %v513_v63 = vpop.eup %512 }
 0x142   :  { %v164_v1 = vsel %vm163_vm5, %v511_v55, %v160_v62  ;;  %v172_v2 = vmul.f32 %v513_v63, %v155_v56  ;;  %vm177_vm7 = vweird.f32 %v513_v63 }
 0x143   :  { %v169_v3 = vsel %vm166_vm6, %v168_v0, %v164_v1  ;;  %vm178_vm9 = vmor %vm176_vm8, %vm177_vm7  ;;  %vm438_vm6 = vcmask 517376  }
 0x144   :  { %v170_v6 = vmul.f32 %v507_v39, %v169_v3  ;;  %v173_v7 = vsub.f32 1.0, %v172_v2 }
 0x146   :  { %198 = vperm.xlu2 %497, %v170_v6   ;;  %186 = vst.msk [vmem:[%s764_s10] sm:$0xff] %vm121_vm2, %v170_v6  ;;  %327 = vperm.xlu1 %496, %v170_v6   ;;  %v174_v9 = vmul.f32 %v513_v63, %v173_v7 }
 0x148   :  { %v175_v11 = vadd.f32 %v513_v63, %v174_v9 }
 0x14a   :  { %v179_v13 = vsel %vm178_vm9, %v513_v63, %v175_v11 }
 0x14b   :  { %v184_v14 = vsel %vm181_vm10, %v183_v12, %v179_v13 }
 0x14c   :  { %v185_v15 = vmul.f32 %v509_v45, %v184_v14 }
 0x14e   :  { %203 = vperm.xlu2 %497, %v185_v15   ;;  %187 = vst.msk [vmem:[%s764_s10 + $0x8] sm:$0xff] %vm121_vm2, %v185_v15  ;;  %331 = vperm.xlu1 %496, %v185_v15  }
 0x1a0   :  { %v199_v20 = vpop.permute.xlu2 %198 }
 0x1a1   :  { %v206_v21 = vmul.f32 %v199_v20, %v665_v4 }
 0x1a3   :  { %v208_v22 = vsel %vm43_vm0, %v206_v21, 0.0 }
 0x1a4   :  { %v209_v23 = vrot.slane %v208_v22, 4 }
 0x1a6   :  { %v210_v24 = vadd.f32 %v209_v23, %v208_v22 }
 0x1a8   :  { %v204_v25 = vpop.permute.xlu2 %203  ;;  %v211_v27 = vrot.slane %v210_v24, 2 }
 0x1a9   :  { %v207_v26 = vmul.f32 %v204_v25, %v672_v5 }
 0x1aa   :  { %v212_v30 = vadd.f32 %v211_v27, %v210_v24 }
 0x1ab   :  { %v215_v28 = vsel %vm43_vm0, %v207_v26, 0.0 }
 0x1ac   :  { %v216_v29 = vrot.slane %v215_v28, 4  ;;  %v213_v33 = vrot.slane %v212_v30, 1 }
 0x1ae   :  { %v217_v31 = vadd.f32 %v216_v29, %v215_v28  ;;  %v214_v36 = vadd.f32 %v213_v33, %v212_v30  ;;  %v586_v30 = vmov 32.0  }
 0x1b0   :  { %v218_v32 = vrot.slane %v217_v31, 2 }
 0x1b2   :  { %v219_v34 = vadd.f32 %v218_v32, %v217_v31 }
 0x1b4   :  { %v220_v35 = vrot.slane %v219_v34, 1 }
 0x1b6   :  { %v221_v37 = vadd.f32 %v220_v35, %v219_v34 }
 0x1b8   :  { %v328_v38 = vpop.permute.xlu1 %327  ;;  %v228_v39 = vsel %vm227_vm11, %v221_v37, %v214_v36 }
 0x1b9   :  { %v334_v40 = vmul.f32 %v328_v38, %v665_v4  ;;  %485 = vmatmul.msk.f32.vlgmr.msra.gmra.mxu2 %vm43_vm0, %v228_v39 }
 0x1bb   :  { %v336_v41 = vsel %vm43_vm0, %v334_v40, 0.0 }
 0x1bc   :  { %v337_v42 = vrot.slane %v336_v41, 4 }
 0x1be   :  { %v338_v43 = vadd.f32 %v337_v42, %v336_v41 }
 0x1c0   :  { %v332_v44 = vpop.permute.xlu1 %331  ;;  %v339_v46 = vrot.slane %v338_v43, 2 }
 0x1c1   :  { %v335_v45 = vmul.f32 %v332_v44, %v672_v5  ;;  %v499_v5 = vld [vmem:[%s760_s6] ss:$0 sm:$0xff] }
 0x1c2   :  { %v340_v49 = vadd.f32 %v339_v46, %v338_v43 }
 0x1c3   :  { %v343_v47 = vsel %vm43_vm0, %v335_v45, 0.0 }
 0x1c4   :  { %v344_v48 = vrot.slane %v343_v47, 4  ;;  %v341_v52 = vrot.slane %v340_v49, 1 }
 0x1c6   :  { %v345_v50 = vadd.f32 %v344_v48, %v343_v47  ;;  %v342_v4 = vadd.f32 %v341_v52, %v340_v49 }
 0x1c8   :  { %v346_v51 = vrot.slane %v345_v50, 2 }
 0x1ca   :  { %v347_v53 = vadd.f32 %v346_v51, %v345_v50 }
 0x1cc   :  { %v348_v54 = vrot.slane %v347_v53, 1 }
 0x1ce   :  { %v349_v55 = vadd.f32 %v348_v54, %v347_v53 }
 0x1d0   :  { %v352_v56 = vsel %vm227_vm11, %v349_v55, %v342_v4 }
 0x1d1   :  { %487 = vmatmul.msk.f32.vlgmr.msra.gmra.mxu3 %vm43_vm0, %v352_v56 }
 0x23c   :  { %v248_v57 = vpop.f32.mrf.mxu2 }
 0x23d   :  { %v249_v58 = vadd.f32 %v499_v5, %v248_v57 }
 0x23f   :  { %v486_v59 = vmul.f32 -1.442695, %v249_v58 }
 0x241   :  { %514 = vpow2.f32 %v486_v59 }
 0x247   :  { %v515_v60 = vpop.eup %514 }
 0x248   :  { %v254_v61 = vadd.f32 1.0, %v515_v60  ;;  %v500_v60 = vld [vmem:[%s761_s7] ss:$0 sm:$0xff]  ;;  %s588_s7 = smov [#allocation4]  }
 0x24a   :  { %516 = vrcp.f32 %v254_v61  ;;  %v266_v2 = vand.u32 2147483648, %v254_v61  ;;  %v264_v7 = vand.u32 2147483647, %v254_v61  ;;  %vm260_vm13 = vweird.f32 %v254_v61 }
 0x24c   :  { %v267_v11 = vor.u32 1.1754944e-38, %v266_v2  ;;  %vm265_vm0 = vcmp.eq.f32.partialorder %v264_v7, 8.507059e+37 }
 0x250   :  { %v517_v62 = vpop.eup %516 }
 0x251   :  { %v256_v63 = vmul.f32 %v517_v62, %v254_v61  ;;  %vm261_vm12 = vweird.f32 %v517_v62 }
 0x252   :  { %vm262_vm14 = vmor %vm260_vm13, %vm261_vm12 }
 0x253   :  { %v257_v0 = vsub.f32 1.0, %v256_v63  ;;  %v501_v63 = vld [vmem:[%s762_s8] ss:$0 sm:$0xff]  ;;  %s463_s8 = sshll.u32 %s588_s7, 4  ;;  %s464_s8 = int_to_ptr.vmem [resolvable:$true] %s463_s8 }
 0x254   :  { %v372_v1 = vpop.f32.mrf.mxu3 }
 0x255   :  { %v373_v3 = vadd.f32 %v499_v5, %v372_v1  ;;  %v258_v6 = vmul.f32 %v517_v62, %v257_v0 }
 0x257   :  { %v488_v8 = vmul.f32 -1.442695, %v373_v3  ;;  %v259_v9 = vadd.f32 %v517_v62, %v258_v6 }
 0x259   :  { %518 = vpow2.f32 %v488_v8  ;;  %v263_v12 = vsel %vm262_vm14, %v517_v62, %v259_v9 }
 0x25a   :  { %v268_v13 = vsel %vm265_vm0, %v267_v11, %v263_v12 }
 0x25b   :  { %v270_v14 = vadd.f32 %v268_v13, %v188_v10  ;;  %324 = vst.msk [vmem:[#allocation4] sm:$0x3] %vm271_vm15, %v268_v13 }
 0x25d   :  { %v272_v15 = vsel %vm271_vm15, %v270_v14, 0.0 }
 0x25e   :  { %273 = vadd.xlane.f32.xlu1 %v272_v15 }
 0x25f   :  { %v519_v16 = vpop.eup %518 }
 0x260   :  { %v378_v17 = vadd.f32 1.0, %v519_v16 }
 0x262   :  { %520 = vrcp.f32 %v378_v17  ;;  %v390_v21 = vand.u32 2147483648, %v378_v17  ;;  %v388_v23 = vand.u32 2147483647, %v378_v17  ;;  %vm384_vm2 = vweird.f32 %v378_v17 }
 0x263   :  { %522 = vrcp.f32 %v586_v30 }
 0x264   :  { %v391_v25 = vor.u32 1.1754944e-38, %v390_v21  ;;  %vm389_vm4 = vcmp.eq.f32.partialorder %v388_v23, 8.507059e+37 }
 0x268   :  { %v521_v18 = vpop.eup %520 }
 0x269   :  { %v380_v19 = vmul.f32 %v521_v18, %v378_v17  ;;  %vm385_vm1 = vweird.f32 %v521_v18  ;;  %v523_v31 = vpop.eup %522 }
 0x26a   :  { %vm386_vm3 = vmor %vm384_vm2, %vm385_vm1  ;;  %v276_v32 = vmul.f32 32.0, %v523_v31  ;;  %vm280_vm5 = vweird.f32 %v523_v31 }
 0x26b   :  { %v381_v20 = vsub.f32 1.0, %v380_v19 }
 0x26c   :  { %v277_v33 = vsub.f32 1.0, %v276_v32 }
 0x26d   :  { %v382_v22 = vmul.f32 %v521_v18, %v381_v20 }
 0x26e   :  { %v278_v34 = vmul.f32 %v523_v31, %v277_v33 }
 0x26f   :  { %v383_v24 = vadd.f32 %v521_v18, %v382_v22 }
 0x270   :  { %v279_v35 = vadd.f32 %v523_v31, %v278_v34 }
 0x271   :  { %v387_v26 = vsel %vm386_vm3, %v521_v18, %v383_v24 }
 0x272   :  { %v392_v27 = vsel %vm389_vm4, %v391_v25, %v387_v26  ;;  %v281_v36 = vsel %vm280_vm5, %v523_v31, %v279_v35 }
 0x273   :  { %v394_v28 = vadd.f32 %v392_v27, %v188_v10 }
 0x275   :  { %v395_v29 = vsel %vm271_vm15, %v394_v28, 0.0 }
 0x276   :  { %396 = vadd.xlane.f32.xlu0 %v395_v29 }
 0x2d1   :  { %v274_v37 = vpop.xlane.xlu1 %273 }
 0x2d2   :  { %v282_v40 = vmul.f32 %v281_v36, %v274_v37 }
 0x2d4   :  { %v283_v43 = vsub.f32 %v270_v14, %v282_v40 }
 0x2d6   :  { %v284_v45 = vmul.f32 %v283_v43, %v283_v43 }
 0x2d8   :  { %v285_v46 = vsel %vm271_vm15, %v284_v45, 0.0 }
 0x2e9   :  { %v397_v38 = vpop.xlane.xlu0 %396 }
 0x2ea   :  { %v398_v39 = vmul.f32 %v397_v38, %v281_v36 }
 0x2ec   :  { %v399_v41 = vsub.f32 %v394_v28, %v398_v39 }
 0x2ee   :  { %v400_v42 = vmul.f32 %v399_v41, %v399_v41 }
 0x2f0   :  { %v401_v44 = vsel %vm271_vm15, %v400_v42, 0.0 }
 0x2f1   :  { %402 = vadd.xlane.f32.xlu2 %v401_v44 }
 0x2f9   :  { %286 = vadd.xlane.f32.xlu2 %v285_v46 }
 0x311   :  { %435 = vrot.lane.b32.xlu2 %v392_v27, %s587_s1 }
 0x364   :  { %v403_v47 = vpop.xlane.xlu2 %402 }
 0x365   :  { %v404_v48 = vmul.f32 %v403_v47, %v281_v36 }
 0x367   :  { %v405_v49 = vadd.f32 1e-05, %v404_v48 }
 0x369   :  { %524 = vrsqrt.f32 %v405_v49  ;;  %vm412_vm8 = vweird.f32 %v405_v49 }
 0x36c   :  { %v287_v50 = vpop.xlane.xlu2 %286 }
 0x36d   :  { %v288_v51 = vmul.f32 %v287_v50, %v281_v36 }
 0x36f   :  { %v525_v52 = vpop.eup %524  ;;  %v289_v53 = vadd.f32 1e-05, %v288_v51 }
 0x370   :  { %v407_v54 = vmul.f32 %v525_v52, %v405_v49  ;;  %vm413_vm7 = vweird.f32 %v525_v52 }
 0x371   :  { %526 = vrsqrt.f32 %v289_v53  ;;  %vm414_vm9 = vmor %vm412_vm8, %vm413_vm7  ;;  %vm296_vm11 = vweird.f32 %v289_v53 }
 0x372   :  { %v408_v4 = vmul.f32 %v525_v52, %v407_v54 }
 0x374   :  { %v409_v55 = vmul.f32 0.5, %v408_v4  ;;  %v436_v56 = vpop.permute.xlu2 %435 }
 0x375   :  { %439 = vst.msk [vmem:[#allocation4] sm:$0x3] %vm438_vm6, %v436_v56 }
 0x376   :  { %v410_v5 = vsub.f32 1.5, %v409_v55  ;;  %468 = dma.vmem_to_hbm [thread:$0]  %s464_s8, 32, %s466_s13, [#allocation5]  }
 0x377   :  { %v527_v57 = vpop.eup %526 }
 0x378   :  { %v411_v58 = vmul.f32 %v525_v52, %v410_v5  ;;  %v291_v59 = vmul.f32 %v527_v57, %v289_v53  ;;  %vm297_vm10 = vweird.f32 %v527_v57 }
 0x379   :  { %vm298_vm12 = vmor %vm296_vm11, %vm297_vm10 }
 0x37a   :  { %v415_v61 = vsel %vm414_vm9, %v525_v52, %v411_v58  ;;  %v292_v62 = vmul.f32 %v527_v57, %v291_v59 }
 0x37b   :  { %v416_v0 = vmul.f32 %v415_v61, %v399_v41 }
 0x37c   :  { %v293_v1 = vmul.f32 0.5, %v292_v62 }
 0x37d   :  { %v417_v2 = vmul.f32 %v500_v60, %v416_v0 }
 0x37e   :  { %v294_v3 = vsub.f32 1.5, %v293_v1 }
 0x37f   :  { %v418_v6 = vadd.f32 %v501_v63, %v417_v2 }
 0x380   :  { %v295_v7 = vmul.f32 %v527_v57, %v294_v3 }
 0x381   :  { %v419_v8 = vmul.f32 %v418_v6, %v418_v6 }
 0x382   :  { %v299_v9 = vsel %vm298_vm12, %v527_v57, %v295_v7 }
 0x383   :  { %v420_v10 = vsel %vm271_vm15, %v419_v8, 0.0  ;;  %v300_v11 = vmul.f32 %v299_v9, %v283_v43 }
 0x384   :  { %421 = vadd.xlane.f32.xlu0 %v420_v10 }
 0x385   :  { %v304_v12 = vmul.f32 %v500_v60, %v300_v11 }
 0x387   :  { %v308_v13 = vadd.f32 %v501_v63, %v304_v12 }
 0x389   :  { %v309_v14 = vmul.f32 %v308_v13, %v308_v13 }
 0x38b   :  { %v310_v15 = vsel %vm271_vm15, %v309_v14, 0.0 }
 0x38c   :  { %311 = vadd.xlane.f32.xlu1 %v310_v15 }
 0x3f7   :  { %v422_v16 = vpop.xlane.xlu0 %421 }
 0x3f8   :  { %528 = vrsqrt.f32 %v422_v16  ;;  %vm429_vm14 = vweird.f32 %v422_v16 }
 0x3fe   :  { %v529_v17 = vpop.eup %528 }
 0x3ff   :  { %v424_v18 = vmul.f32 %v529_v17, %v422_v16  ;;  %v312_v19 = vpop.xlane.xlu1 %311  ;;  %vm430_vm13 = vweird.f32 %v529_v17 }
 0x400   :  { %530 = vrsqrt.f32 %v312_v19  ;;  %vm431_vm0 = vmor %vm429_vm14, %vm430_vm13  ;;  %vm319_vm2 = vweird.f32 %v312_v19 }
 0x401   :  { %v425_v20 = vmul.f32 %v529_v17, %v424_v18 }
 0x403   :  { %v426_v21 = vmul.f32 0.5, %v425_v20 }
 0x405   :  { %v427_v22 = vsub.f32 1.5, %v426_v21 }
 0x406   :  { %v531_v23 = vpop.eup %530 }
 0x407   :  { %v428_v24 = vmul.f32 %v529_v17, %v427_v22  ;;  %v314_v25 = vmul.f32 %v531_v23, %v312_v19  ;;  %vm320_vm1 = vweird.f32 %v531_v23 }
 0x408   :  { %vm321_vm3 = vmor %vm319_vm2, %vm320_vm1 }
 0x409   :  { %v315_v26 = vmul.f32 %v531_v23, %v314_v25  ;;  %v432_v27 = vsel %vm431_vm0, %v529_v17, %v428_v24 }
 0x40a   :  { %v433_v28 = vmul.f32 %v432_v27, %v418_v6 }
 0x40b   :  { %v316_v29 = vmul.f32 0.5, %v315_v26 }
 0x40c   :  { %441 = vrot.lane.b32.xlu0 %v433_v28, %s587_s1 }
 0x40d   :  { %v317_v30 = vsub.f32 1.5, %v316_v29 }
 0x40f   :  { %v318_v31 = vmul.f32 %v531_v23, %v317_v30 }
 0x411   :  { %v322_v32 = vsel %vm321_vm3, %v531_v23, %v318_v31 }
 0x412   :  { %v323_v33 = vmul.f32 %v322_v32, %v308_v13 }
 0x414   :  { %325 = vst.msk [vmem:[#allocation2] sm:$0x3] %vm271_vm15, %v323_v33 }
 0x47e   :  { %v442_v34 = vpop.permute.xlu0 %441 }
 0x47f   :  { %444 = vst.msk [vmem:[#allocation2] sm:$0x3] %vm438_vm6, %v442_v34 }
 0x480   :  { %455 = dma.vmem_to_hbm [thread:$0]  %s451_s14, 32, %s453_s2, [#allocation3]  }
 0x481   :  { %580 = dma.done.wait [#allocation3], 32  }
 0x482   :  { %581 = vsyncadd [#allocation3], 4294967264 }
 0x483   :  { %582 = dma.done.wait [#allocation5], 32  }
 0x484   :  { %583 = vsyncadd [#allocation5], 4294967264 }
 0x485   :  { %479 = vsyncpa [#allocation3], 1 }
 0x486   :  { %480 = vsyncpa [#allocation5], 1 }

</bundles_post_ra>
